<compile_context>
chip_gen: v5e
topology: v5e:2x2
jax: 0.10.0
libtpu: 0.0.40
codegen_flags: <defaults>
</compile_context>

<pallas_src>
import math

import jax
import jax.numpy as jnp
from jax import lax
from jax.experimental import pallas as pl
from jax.experimental.pallas import tpu as pltpu


_TWO_PI = 2.0 * math.pi


def _gfft_kernel(x_ref, b_ref, o_ref):
    """x_ref: (TILE_M, D)   b_ref: (F/2, D) = B^T (f32)   o_ref: (TILE_M, F)."""
    x = x_ref[...].astype(jnp.float32)          # (TILE_M, D)
    b = b_ref[...]                              # (HF, D), f32
    hf = b.shape[0]

    if hf % 128 == 0:
        # Natural layout is already lane-dense: proj = (TILE_M, HF), no transposes.
        r = lax.dot_general(x, b, (((1,), (1,)), ((), ())),
                            preferred_element_type=jnp.float32)
        arg = (r - jnp.round(r)) * _TWO_PI      # range-reduce, then scale by 2*pi
        o_ref[:, :hf] = jnp.sin(arg).astype(o_ref.dtype)
        o_ref[:, hf:] = jnp.cos(arg).astype(o_ref.dtype)
    else:
        # Small HF: compute with rows (M) on the lane axis so the sin/cos vregs
        # are fully used, then transpose the (HF, TILE_M) results on the idle XLU
        # slot before storing into the natural (TILE_M, F) output block.
        r = lax.dot_general(b, x, (((1,), (1,)), ((), ())),
                            preferred_element_type=jnp.float32)  # (HF, TILE_M)
        arg = (r - jnp.round(r)) * _TWO_PI
        o_ref[:, :hf] = jnp.sin(arg).T.astype(o_ref.dtype)
        o_ref[:, hf:] = jnp.cos(arg).T.astype(o_ref.dtype)


def _vmem_capacity_bytes() -> int:
    """Per-generation VMEM capacity; conservative (v7x) fallback if unavailable."""
    try:
        cap = int(pltpu.get_tpu_info().vmem_capacity_bytes)
        if cap > 0:
            return cap
    except Exception:
        pass
    return 64 * 1024 * 1024


def _pick_tile_m(m, dim, n_ff, in_itemsize, out_itemsize, block_budget):
    """Largest lane-aligned row tile whose double-buffered in+out blocks fit the
    VMEM block budget, keeping >=2 grid steps on large problems (v7x megacore)."""
    if m <= 128:
        return int(m)                              # single block == full array dims
    per_row = 2 * (dim * in_itemsize + n_ff * out_itemsize)   # x2: double buffering
    t = block_budget // per_row
    t = max(128, min(32768, (t // 128) * 128))
    t = min(t, pl.cdiv(m, 128) * 128)              # don't tile past padded row count
    if m > 2 * 128:
        # Leave at least two grid steps so both v7x TensorCores get work.
        t = min(t, max(128, pl.cdiv(pl.cdiv(m, 2), 128) * 128))
    return int(t)


def gaussian_fourier_feature_transform(x: jax.Array, B: jax.Array,
                                       out_dtype=None) -> jax.Array:
    """x: [..., time, input_dim], B: [input_dim, n_fourier_feats // 2]."""
    assert x.ndim >= 2, f"Expected >=2D input (got {x.ndim}D)"
    *lead, time, dim = x.shape
    assert dim == B.shape[0], f"Expected input with {B.shape[0]} channels (got {dim})"
    half_f = B.shape[1]
    n_ff = 2 * half_f
    m = math.prod(lead) * time

    if out_dtype is None:
        # Keep module semantics: output dtype == input (floating) dtype.
        # TODO(synk): pass out_dtype=jnp.bfloat16 where downstream tolerates it to
        # halve the dominant HBM write traffic on v5e/v6e (compute stays f32).
        out_dtype = x.dtype if jnp.issubdtype(x.dtype, jnp.floating) else jnp.float32
    out_dtype = jnp.dtype(out_dtype)

    # Free, row-major-contiguous reshape — no wrapper-side relayout.
    x2 = x.reshape(m, dim)
    bt = B.astype(jnp.float32).T                 # (F/2, D), tiny, built once

    cap = _vmem_capacity_bytes()
    tile_m = _pick_tile_m(m, dim, n_ff, x2.dtype.itemsize, out_dtype.itemsize,
                          block_budget=cap // 4)
    grid = (pl.cdiv(m, tile_m),)

    cost = pl.CostEstimate(
        flops=2 * m * dim * half_f,
        transcendentals=m * n_ff,
        bytes_accessed=(m * dim * x2.dtype.itemsize
                        + half_f * dim * 4
                        + m * n_ff * out_dtype.itemsize),
    )

    out = pl.pallas_call(
        _gfft_kernel,
        out_shape=jax.ShapeDtypeStruct((m, n_ff), out_dtype),
        grid=grid,
        in_specs=[
            pl.BlockSpec((tile_m, dim), lambda i: (i, 0)),    # natural x layout
            pl.BlockSpec((half_f, dim), lambda i: (0, 0)),    # resident B^T
        ],
        out_specs=pl.BlockSpec((tile_m, n_ff), lambda i: (i, 0)),  # natural output
        compiler_params=pltpu.CompilerParams(
            dimension_semantics=("parallel",),   # shard rows across TCs on v7x
            vmem_limit_bytes=int(cap // 2),
        ),
        cost_estimate=cost,
    )(x2, bt)

    return out.reshape(*lead, time, n_ff)


def make_B(key, input_dim: int, n_fourier_feats: int, scales):
    n_scale_feats = n_fourier_feats // (2 * len(scales))
    assert n_scale_feats * 2 * len(scales) == n_fourier_feats, (
        f"n_fourier_feats: {n_fourier_feats} must be divisible by "
        f"2 * len(scales) = {2 * len(scales)}"
    )
    keys = jax.random.split(key, len(scales))
    parts = [
        jax.random.normal(k, (input_dim, n_scale_feats), dtype=jnp.float32) * s
        for k, s in zip(keys, scales)
    ]
    return jnp.concatenate(parts, axis=1)


if __name__ == "__main__":
    key = jax.random.PRNGKey(0)
    k_b, k_x = jax.random.split(key)

    input_dim = 4
    n_fourier_feats = 32
    scales = [1.0, 10.0]
    batch, time = 2, 8

    B = make_B(k_b, input_dim, n_fourier_feats, scales)
    x = jax.random.normal(k_x, (batch, time, input_dim), dtype=jnp.float32)

    out = gaussian_fourier_feature_transform(x, B)
    out = jax.block_until_ready(out)

    # Reference faithful to the PyTorch spec (2*pi applied AFTER the einsum).
    # The kernel range-reduces before sin/cos, which is mathematically identical
    # and more accurate; with |2*pi*(x@B)| ~ O(10^2) the f32 reference itself is
    # only good to ~|arg|*eps ~ 1e-4, so 1e-3 cleanly separates right from wrong.
    proj = 2.0 * math.pi * jnp.einsum("btn,nd->btd", x, B)
    ref = jnp.concatenate([jnp.sin(proj), jnp.cos(proj)], axis=-1)
    assert out.shape == (batch, time, n_fourier_feats)
    assert out.dtype == x.dtype
    err = float(jnp.max(jnp.abs(out - ref)))
    assert err < 1e-3, f"max abs err {err}"

    print("KERNEL_OK")
</pallas_src>

<mosaic_0001>
module attributes {stable_mosaic.version = 11 : i64} {
  func.func @_gfft_kernel(%arg0: i32, %arg1: memref<16x4xf32, #tpu.memory_space<vmem>>, %arg2: memref<16x4xf32, #tpu.memory_space<vmem>>, %arg3: memref<16x32xf32, #tpu.memory_space<vmem>>) attributes {dimension_semantics = [#tpu.dimension_semantics<parallel>], iteration_bounds = array<i64: 1>, scalar_prefetch = 0 : i64, scratch_operands = 0 : i64, tpu.core_type = #tpu.core_type<tc>, window_params = [{transform_indices = @transform_0, window_bounds = array<i64: 16, 4>}, {pipeline_mode = #tpu.pipeline_mode<synchronous>, transform_indices = @transform_1, window_bounds = array<i64: 16, 4>}, {transform_indices = @transform_2, window_bounds = array<i64: 16, 32>}]} {
    %c0 = arith.constant 0 : index
    %c0_0 = arith.constant 0 : index
    %0 = vector.load %arg1[%c0, %c0_0] : memref<16x4xf32, #tpu.memory_space<vmem>>, vector<16x4xf32>
    %c0_1 = arith.constant 0 : index
    %c0_2 = arith.constant 0 : index
    %1 = vector.load %arg2[%c0_1, %c0_2] : memref<16x4xf32, #tpu.memory_space<vmem>>, vector<16x4xf32>
    %cst = arith.constant dense<0.000000e+00> : vector<16x16xf32>
    %2 = tpu.matmul %1, %0, %cst {dimension_numbers = #tpu.dot_dimension_numbers<[1], [1], [0], [0], [0, 0, 1, 0], [], []>} : vector<16x4xf32>, vector<16x4xf32>, vector<16x16xf32> -> vector<16x16xf32>
    %3 = math.roundeven %2 : vector<16x16xf32>
    %4 = arith.subf %2, %3 : vector<16x16xf32>
    %cst_3 = arith.constant 6.28318548 : f32
    %5 = vector.broadcast %cst_3 : f32 to vector<16x16xf32>
    %6 = arith.mulf %4, %5 : vector<16x16xf32>
    %7 = math.sin %6 : vector<16x16xf32>
    %8 = tpu.transpose %7, [1, 0] : vector<16x16xf32> -> vector<16x16xf32>
    %c0_4 = arith.constant 0 : index
    %c0_5 = arith.constant 0 : index
    %9 = vector.load %arg3[%c0_4, %c0_5] : memref<16x32xf32, #tpu.memory_space<vmem>>, vector<16x16xf32>
    tpu.vector_store %arg3[%c0_4, %c0_5], %8 {strides = array<i32>} : memref<16x32xf32, #tpu.memory_space<vmem>>, vector<16x16xf32>,
    %10 = math.cos %6 : vector<16x16xf32>
    %11 = tpu.transpose %10, [1, 0] : vector<16x16xf32> -> vector<16x16xf32>
    %c0_6 = arith.constant 0 : index
    %c16 = arith.constant 16 : index
    %12 = vector.load %arg3[%c0_6, %c16] : memref<16x32xf32, #tpu.memory_space<vmem>>, vector<16x16xf32>
    tpu.vector_store %arg3[%c0_6, %c16], %11 {strides = array<i32>} : memref<16x32xf32, #tpu.memory_space<vmem>>, vector<16x16xf32>,
    return
  }
  func.func @transform_0(%arg0: i32) -> (i32, i32) {
    %c0_i32 = arith.constant 0 : i32
    %c0_i32_0 = arith.constant 0 : i32
    return %arg0, %c0_i32 : i32, i32
  }
  func.func @transform_1(%arg0: i32) -> (i32, i32) {
    %c0_i32 = arith.constant 0 : i32
    %c0_i32_0 = arith.constant 0 : i32
    %c0_i32_1 = arith.constant 0 : i32
    return %c0_i32, %c0_i32_0 : i32, i32
  }
  func.func @transform_2(%arg0: i32) -> (i32, i32) {
    %c0_i32 = arith.constant 0 : i32
    %c0_i32_0 = arith.constant 0 : i32
    return %arg0, %c0_i32 : i32, i32
  }
}

</mosaic_0001>

<bundles_post_ra>
// kernel: tpu_custom_call.1
= control target key start
LH: loop header
LB: loop body
LE: loop exit
PB: predicated region body
PF: predicated region fallthrough
CT: control target
= control target key end

     0   :  { %vm16_vm0 = vcmask 31744   ;;  %s1055_s0 = inlined_call_operand.vmem [shape: f32[16,4], index: 0, kind: input, shape index: {}]   ;;  %s1056_s1 = inlined_call_operand.vmem [shape: f32[16,4], index: 1, kind: input, shape index: {}]   ;;  %s1057_s2 = inlined_call_operand.hbm [shape: f32[16,32], index: 2, kind: output, shape index: {}]  }
   0x1   :  { %v13_v0 = vld [vmem:[%s1055_s0 + $0x8] sm:$0xff] }
   0x2   :  { %772 = vmatpush.xpose.msk.msra.mxu0 %vm16_vm0, %v13_v0  ;;  %788 = vmatpush.xpose.msk.msra.mxu1 %vm16_vm0, %v13_v0 }
   0x3   :  { %7 = vsyncpa [#allocation3], 0  ;;  %v12_v1 = vld [vmem:[%s1055_s0] sm:$0xff]  ;;  %v15_v3 = vld [vmem:[%s1056_s1 + $0x8] sm:$0xff]  ;;  %v844_v47 = vmov 683565275  }
   0x4   :  { %v14_v2 = vld [vmem:[%s1056_s1] sm:$0xff]  ;;  %v845_v49 = vmov 2475754826   ;;  %v846_v51 = vmov 2131351028   ;;  %s851_s0 = smov 16  }
   0x5   :  { %v847_v56 = vmov 2102212464   ;;  %v848_v59 = vmov 920167782   ;;  %v849_v62 = vmov 1326507024  }
   0x6   :  { %773 = vmatpush.xpose.msk.msra.mxu0 %vm16_vm0, %v12_v1  ;;  %789 = vmatpush.xpose.msk.msra.mxu1 %vm16_vm0, %v12_v1  ;;  %s852_s1 = smov [#allocation2]   ;;  %s760_s20 = sshll.u32 %s1057_s2, 4  ;;  %s761_s20 = int_to_ptr.hbm [resolvable:$true] %s760_s20 }
   0x7   :  { %s758_s17 = sshll.u32 %s852_s1, 4  ;;  %s853_s21 = smov 128   ;;  %s759_s17 = int_to_ptr.vmem [resolvable:$true] %s758_s17 }
   0x8   :  { %s854_s22 = smov 8  }
   0x9   :  { %774 = vmatmul.msk.f32.vlgmr.msra.gmra.mxu0 %vm16_vm0, %v14_v2  ;;  %775 = vmatmul.msk.f32.vlgmr.msra.gmra.mxu1 %vm16_vm0, %v15_v3 }
  0x86   :  { %v46_v4 = vpop.f32.mrf.mxu0  ;;  %v49_v5 = vpop.f32.mrf.mxu1 }
  0x87   :  { %v792_v6 = vcvt.f32.s32 %v46_v4  ;;  %v800_v7 = vcvt.f32.s32 %v49_v5  ;;  %v798_v9 = vand.u32 2147483647, %v49_v5  ;;  %v790_v10 = vand.u32 2147483647, %v46_v4 }
  0x88   :  { %v803_v12 = vand.u32 2147483648, %v49_v5  ;;  %v795_v14 = vand.u32 2147483648, %v46_v4 }
  0x89   :  { %v793_v8 = vcvt.s32.f32 %v792_v6  ;;  %v801_v11 = vcvt.s32.f32 %v800_v7  ;;  %vm799_vm1 = vcmp.lt.f32.partialorder %v798_v9, 8388608.0  ;;  %vm791_vm2 = vcmp.lt.f32.partialorder %v790_v10, 8388608.0 }
  0x8b   :  { %v794_v13 = vand.u32 2147483647, %v793_v8  ;;  %v802_v15 = vand.u32 2147483647, %v801_v11 }
  0x8d   :  { %v796_v16 = vor.u32 %v795_v14, %v794_v13  ;;  %v804_v17 = vor.u32 %v803_v12, %v802_v15 }
  0x8f   :  { %v797_v18 = vsel %vm791_vm2, %v796_v16, %v46_v4  ;;  %v805_v20 = vsel %vm799_vm1, %v804_v17, %v49_v5 }
  0x90   :  { %v54_v19 = vsub.f32 %v46_v4, %v797_v18  ;;  %v55_v21 = vsub.f32 %v49_v5, %v805_v20 }
  0x92   :  { %v882_v22 = vmul.f32 6.2831855, %v54_v19  ;;  %v884_v23 = vmul.f32 6.2831855, %v55_v21 }
  0x94   :  { %v61_v24 = vand.u32 2139095040, %v882_v22  ;;  %v58_v25 = vand.u32 2147483647, %v882_v22  ;;  %v216_v26 = vand.u32 2139095040, %v884_v23  ;;  %v213_v27 = vand.u32 2147483647, %v884_v23 }
  0x96   :  { %v62_v28 = vshrl.u32 %v61_v24, 23  ;;  %v65_v29 = vand.u32 8388607, %v58_v25  ;;  %v217_v30 = vshrl.u32 %v216_v26, 23  ;;  %v220_v33 = vand.u32 8388607, %v213_v27 }
  0x98   :  { %v776_v31 = vadd.s32 4294967169, %v62_v28  ;;  %v66_v32 = vor.u32 8388608, %v65_v29  ;;  %v779_v34 = vadd.s32 4294967169, %v217_v30  ;;  %v221_v38 = vor.u32 8388608, %v220_v33 }
  0x9a   :  { %v68_v35 = vadd.s32 1, %v776_v31  ;;  %v223_v36 = vadd.s32 1, %v779_v34  ;;  %v894_v37 = vshll.u32 %v66_v32, 8  ;;  %v899_v45 = vshll.u32 %v221_v38, 8 }
  0x9c   :  { %vm69_vm3 = vcmp.gt.s32.totalorder %v68_v35, 0  ;;  %vm224_vm4 = vcmp.gt.s32.totalorder %v223_v36, 0  ;;  %v107_v44 = vand.u32 65535, %v894_v37  ;;  %v108_v3 = vshrl.u32 %v894_v37, 16 }
  0x9d   :  { %v70_v39 = vsel %vm69_vm3, %v68_v35, 0  ;;  %v225_v41 = vsel %vm224_vm4, %v223_v36, 0 }
  0x9e   :  { %v72_v40 = vand.u32 31, %v70_v39  ;;  %v896_v42 = vand.u32 31, %v225_v41  ;;  %v901_v46 = vshrl.u32 %v70_v39, 5  ;;  %v911_v4 = vshrl.u32 %v225_v41, 5 }
  0xa0   :  { %v73_v43 = vsub.s32 32, %v72_v40  ;;  %v75_v48 = vshll.u32 %v844_v47, %v72_v40  ;;  %v78_v50 = vshll.u32 %v845_v49, %v72_v40  ;;  %v81_v52 = vshll.u32 %v846_v51, %v72_v40 }
  0xa1   :  { %v905_v53 = vsub.s32 32, %v896_v42  ;;  %v84_v58 = vshll.u32 %v847_v56, %v72_v40  ;;  %v87_v61 = vshll.u32 %v848_v59, %v72_v40  ;;  %vm90_vm5 = vcmp.lt.s32.totalorder %v901_v46, 1 }
  0xa2   :  { %v76_v54 = vshrl.u32 %v845_v49, %v73_v43  ;;  %v79_v55 = vshrl.u32 %v846_v51, %v73_v43  ;;  %v82_v57 = vshrl.u32 %v847_v56, %v73_v43  ;;  %v85_v60 = vshrl.u32 %v848_v59, %v73_v43 }
  0xa3   :  { %v88_v63 = vshrl.u32 %v849_v62, %v73_v43  ;;  %v74_v7 = vshrl.u32 %v844_v47, %v73_v43  ;;  %vm93_vm6 = vcmp.lt.s32.totalorder %v901_v46, 4  ;;  %vm92_vm7 = vcmp.lt.s32.totalorder %v901_v46, 3 }
  0xa4   :  { %v77_v0 = vor.u32 %v76_v54, %v75_v48  ;;  %v80_v1 = vor.u32 %v79_v55, %v78_v50  ;;  %v83_v2 = vor.u32 %v82_v57, %v81_v52  ;;  %v86_v5 = vor.u32 %v85_v60, %v84_v58 }
  0xa5   :  { %v89_v6 = vor.u32 %v88_v63, %v87_v61  ;;  %v231_v12 = vshrl.u32 %v845_v49, %v905_v53  ;;  %vm91_vm8 = vcmp.lt.s32.totalorder %v901_v46, 2  ;;  %v230_v19 = vshll.u32 %v844_v47, %v896_v42 }
  0xa6   :  { %v98_v8 = vsel %vm90_vm5, %v77_v0, %v80_v1  ;;  %v102_v9 = vsel %vm90_vm5, %v80_v1, %v83_v2  ;;  %v99_v10 = vsel %vm93_vm6, %v86_v5, 920167782  ;;  %v95_v13 = vsel %vm93_vm6, %v83_v2, 2102212464 }
  0xa7   :  { %v103_v11 = vsel %vm93_vm6, %v89_v6, 1326507024  ;;  %v100_v14 = vsel %vm92_vm7, %v83_v2, %v99_v10  ;;  %v923_v16 = vsel %vm90_vm5, %v74_v7, %v77_v0  ;;  %v96_v28 = vsel %vm92_vm7, %v80_v1, %v95_v13 }
  0xa8   :  { %v104_v15 = vsel %vm92_vm7, %v86_v5, %v103_v11  ;;  %v101_v17 = vsel %vm91_vm8, %v98_v8, %v100_v14  ;;  %v933_v29 = vor.u32 %v231_v12, %v230_v19  ;;  %v233_v30 = vshll.u32 %v845_v49, %v896_v42 }
  0xa9   :  { %v105_v18 = vsel %vm91_vm8, %v102_v9, %v104_v15  ;;  %v131_v24 = vand.u32 65535, %v101_v17  ;;  %v132_v26 = vshrl.u32 %v101_v17, 16  ;;  %v234_v31 = vshrl.u32 %v846_v51, %v905_v53 }
  0xaa   :  { %v109_v20 = vand.u32 65535, %v105_v18  ;;  %v110_v21 = vshrl.u32 %v105_v18, 16  ;;  %v236_v34 = vshll.u32 %v846_v51, %v896_v42  ;;  %v237_v35 = vshrl.u32 %v847_v56, %v905_v53 }
  0xab   :  { %v134_v38 = vmul.u32 %v132_v26, %v107_v44  ;;  %v135_v39 = vmul.u32 %v131_v24, %v108_v3  ;;  %v239_v40 = vshll.u32 %v847_v56, %v896_v42  ;;  %v133_v48 = vmul.u32 %v131_v24, %v107_v44 }
  0xac   :  { %v112_v32 = vmul.u32 %v110_v21, %v107_v44  ;;  %v113_v33 = vmul.u32 %v109_v20, %v108_v3  ;;  %v111_v36 = vmul.u32 %v109_v20, %v107_v44  ;;  %v114_v41 = vmul.u32 %v110_v21, %v108_v3 }
  0xad   :  { %v136_v50 = vmul.u32 %v132_v26, %v108_v3  ;;  %v137_v55 = vshll.u32 %v134_v38, 16  ;;  %v139_v58 = vshll.u32 %v135_v39, 16  ;;  %v940_v60 = vor.u32 %v234_v31, %v233_v30 }
  0xae   :  { %v115_v43 = vshll.u32 %v112_v32, 16  ;;  %v116_v52 = vshrl.u32 %v112_v32, 16  ;;  %v117_v54 = vshll.u32 %v113_v33, 16  ;;  %v118_v49 = vshrl.u32 %v113_v33, 16 }
  0xaf   :  { %v850_v51 = vmov 0   ;;  %vm141_vm10 = vc.u32 %v133_v48, %v137_v55  ;;  %v143_v63 = vadd.s32 %v137_v55, %v133_v48  ;;  %v240_v56 = vshrl.u32 %v848_v59, %v905_v53 }
  0xb0   :  { %vm119_vm9 = vc.u32 %v111_v36, %v115_v43  ;;  %v121_v57 = vadd.s32 %v115_v43, %v111_v36  ;;  %v142_v44 = vsel %vm141_vm10, 1, %v850_v51  ;;  %v946_v1 = vor.u32 %v237_v35, %v236_v34 }
  0xb1   :  { %v120_v61 = vsel %vm119_vm9, 1, %v850_v51  ;;  %v144_v3 = vadd.s32 %v142_v44, %v136_v50  ;;  %vm145_vm12 = vc.u32 %v143_v63, %v139_v58  ;;  %v242_v5 = vshll.u32 %v848_v59, %v896_v42 }
  0xb2   :  { %v122_v0 = vadd.s32 %v120_v61, %v114_v41  ;;  %vm123_vm11 = vc.u32 %v121_v57, %v117_v54  ;;  %v146_v7 = vsel %vm145_vm12, 1, %v850_v51  ;;  %v241_v8 = vor.u32 %v240_v56, %v239_v40 }
  0xb3   :  { %v124_v2 = vsel %vm123_vm11, 1, %v850_v51  ;;  %v243_v9 = vshrl.u32 %v849_v62, %v905_v53  ;;  %v138_v10 = vshrl.u32 %v134_v38, 16  ;;  %v140_v11 = vshrl.u32 %v135_v39, 16 }
  0xb4   :  { %v126_v6 = vadd.s32 %v124_v2, %v122_v0  ;;  %v954_v12 = vadd.s32 %v143_v63, %v139_v58  ;;  %v148_v13 = vadd.s32 %v146_v7, %v144_v3  ;;  %vm245_vm13 = vcmp.lt.s32.totalorder %v911_v4, 1 }
  0xb5   :  { %v244_v15 = vor.u32 %v243_v9, %v242_v5  ;;  %vm248_vm14 = vcmp.lt.s32.totalorder %v911_v4, 4  ;;  %vm247_vm15 = vcmp.lt.s32.totalorder %v911_v4, 3  ;;  %v253_v42 = vsel %vm245_vm13, %v933_v29, %v940_v60 }
  0xb6   :  { %v127_v14 = vadd.s32 %v126_v6, %v116_v52  ;;  %v149_v17 = vadd.s32 %v148_v13, %v138_v10  ;;  %v254_v59 = vsel %vm248_vm14, %v241_v8, 920167782  ;;  %vm246_vm0 = vcmp.lt.s32.totalorder %v911_v4, 2 }
  0xb7   :  { %v255_v18 = vsel %vm247_vm15, %v946_v1, %v254_v59  ;;  %v257_v19 = vsel %vm245_vm13, %v940_v60, %v946_v1  ;;  %v97_v20 = vsel %vm91_vm8, %v923_v16, %v96_v28  ;;  %v258_v26 = vsel %vm248_vm14, %v244_v15, 1326507024 }
  0xb8   :  { %v965_v62 = vadd.s32 %v127_v14, %v118_v49  ;;  %v150_v21 = vadd.s32 %v149_v17, %v140_v11  ;;  %v256_v24 = vsel %vm246_vm0, %v253_v42, %v255_v18  ;;  %v259_v30 = vsel %vm247_vm15, %v241_v8, %v258_v26 }
  0xb9   :  { %v262_v31 = vand.u32 65535, %v899_v45  ;;  %v286_v32 = vand.u32 65535, %v256_v24  ;;  %v260_v46 = vsel %vm246_vm0, %v257_v19, %v259_v30  ;;  %v263_v16 = vshrl.u32 %v899_v45, 16 }
  0xba   :  { %vm153_vm1 = vc.u32 %v965_v62, %v954_v12  ;;  %v154_v33 = vadd.s32 1, %v150_v21  ;;  %v287_v28 = vshrl.u32 %v256_v24, 16  ;;  %v151_v34 = vmul.u32 %v894_v37, %v97_v20 }
  0xbb   :  { %v264_v35 = vand.u32 65535, %v260_v46  ;;  %v265_v36 = vshrl.u32 %v260_v46, 16  ;;  %v290_v40 = vmul.u32 %v286_v32, %v263_v16  ;;  %v288_v50 = vmul.u32 %v286_v32, %v262_v31 }
  0xbc   :  { %v155_v38 = vsel %vm153_vm1, %v154_v33, %v150_v21  ;;  %v289_v39 = vmul.u32 %v287_v28, %v262_v31  ;;  %v291_v52 = vmul.u32 %v287_v28, %v263_v16  ;;  %v250_v7 = vsel %vm248_vm14, %v946_v1, 2102212464 }
  0xbd   :  { %v156_v41 = vadd.s32 %v155_v38, %v151_v34  ;;  %v267_v43 = vmul.u32 %v265_v36, %v262_v31  ;;  %v268_v48 = vmul.u32 %v264_v35, %v263_v16  ;;  %v266_v55 = vmul.u32 %v264_v35, %v262_v31 }
  0xbe   :  { %v292_v54 = vshll.u32 %v289_v39, 16  ;;  %v269_v57 = vmul.u32 %v265_v36, %v263_v16  ;;  %v294_v63 = vshll.u32 %v290_v40, 16  ;;  %v229_v11 = vshrl.u32 %v844_v47, %v905_v53 }
  0xbf   :  { %v157_v49 = vadd.s32 536870912, %v156_v41  ;;  %v270_v58 = vshll.u32 %v267_v43, 16  ;;  %v272_v61 = vshll.u32 %v268_v48, 16  ;;  %v271_v15 = vshrl.u32 %v267_v43, 16 }
  0xc0   :  { %vm296_vm2 = vc.u32 %v288_v50, %v292_v54  ;;  %v298_v56 = vadd.s32 %v292_v54, %v288_v50  ;;  %v293_v17 = vshrl.u32 %v289_v39, 16  ;;  %v249_v59 = vsel %vm245_vm13, %v229_v11, %v933_v29 }
  0xc1   :  { %v991_v37 = vshrl.u32 %v157_v49, 30  ;;  %vm274_vm3 = vc.u32 %v266_v55, %v270_v58  ;;  %v276_v0 = vadd.s32 %v270_v58, %v266_v55  ;;  %v297_v44 = vsel %vm296_vm2, 1, %v850_v51 }
  0xc2   :  { %v275_v2 = vsel %vm274_vm3, 1, %v850_v51  ;;  %v299_v3 = vadd.s32 %v297_v44, %v291_v52  ;;  %vm300_vm4 = vc.u32 %v298_v56, %v294_v63  ;;  %v251_v1 = vsel %vm247_vm15, %v940_v60, %v250_v7 }
  0xc3   :  { %v159_v5 = vshll.u32 %v991_v37, 30  ;;  %v277_v6 = vadd.s32 %v275_v2, %v269_v57  ;;  %vm278_vm5 = vc.u32 %v276_v0, %v272_v61  ;;  %v301_v9 = vsel %vm300_vm4, 1, %v850_v51 }
  0xc4   :  { %v279_v8 = vsel %vm278_vm5, 1, %v850_v51  ;;  %v303_v14 = vadd.s32 %v301_v9, %v299_v3  ;;  %v273_v18 = vshrl.u32 %v268_v48, 16  ;;  %v295_v19 = vshrl.u32 %v290_v40, 16 }
  0xc5   :  { %v160_v10 = vsub.s32 %v156_v41, %v159_v5  ;;  %v281_v13 = vadd.s32 %v279_v8, %v277_v6  ;;  %v252_v26 = vsel %vm246_vm0, %v249_v59, %v251_v1  ;;  %v302_v30 = vadd.s32 %v298_v56, %v294_v63 }
  0xc6   :  { %v304_v20 = vadd.s32 %v303_v14, %v293_v17  ;;  %v306_v29 = vmul.u32 %v899_v45, %v252_v26  ;;  %v152_v46 = vadd.s32 %v954_v12, %v965_v62  ;;  %vm60_vm10 = vcmp.lt.s32.totalorder %v882_v22, 0 }
  0xc7   :  { %vm161_vm6 = vcmp.lt.s32.totalorder %v160_v10, 0  ;;  %v162_v42 = vsub.s32 0, %v160_v10  ;;  %v282_v51 = vadd.s32 %v281_v13, %v271_v15  ;;  %vm1020_vm11 = vcmp.le.f32.partialorder %v58_v25, 0.7853982 }
  0xc8   :  { %v305_v24 = vadd.s32 %v304_v20, %v295_v19  ;;  %v182_v61 = vsub.s32 4, %v991_v37  ;;  %vm215_vm13 = vcmp.lt.s32.totalorder %v884_v23, 0  ;;  %vm1034_vm0 = vcmp.le.f32.partialorder %v213_v27, 0.7853982 }
  0xc9   :  { %v163_v21 = vsel %vm161_vm6, %v162_v42, %v160_v10  ;;  %v283_v53 = vadd.s32 %v282_v51, %v273_v18  ;;  %vm201_vm5 = vweird.f32 %v882_v22 }
  0xca   :  { %v164_v47 = vclz %v163_v21  ;;  %v309_v32 = vadd.s32 1, %v305_v24  ;;  %v183_v44 = vsel %vm60_vm10, %v182_v61, %v991_v37 }
  0xcb   :  { %vm308_vm7 = vc.u32 %v283_v53, %v302_v30  ;;  %v307_v6 = vadd.s32 %v302_v30, %v283_v53 }
  0xcc   :  { %v777_v31 = vadd.s32 4294967294, %v164_v47  ;;  %v310_v60 = vsel %vm308_vm7, %v309_v32, %v305_v24 }
  0xcd   :  { %v311_v34 = vadd.s32 %v310_v60, %v306_v29 }
  0xce   :  { %vm778_vm8 = vcmp.lt.s32.totalorder %v777_v31, 0 }
  0xcf   :  { %v167_v33 = vsel %vm778_vm8, 0, %v777_v31  ;;  %v312_v4 = vadd.s32 536870912, %v311_v34 }
  0xd0   :  { %v168_v16 = vsub.s32 32, %v167_v33  ;;  %v172_v28 = vsub.s32 4294967266, %v167_v33  ;;  %v169_v35 = vshll.u32 %v160_v10, %v167_v33  ;;  %v185_v10 = vsel %vm1020_vm11, 0, %v183_v44 }
  0xd1   :  { %v1014_v41 = vshrl.u32 %v312_v4, 30  ;;  %v202_v18 = vadd.s32 3, %v185_v10  ;;  %v547_v21 = vand.u32 3, %v185_v10 }
  0xd2   :  { %v170_v36 = vshrl.u32 %v152_v46, %v168_v16  ;;  %v173_v38 = vadd.s32 127, %v172_v28 }
  0xd3   :  { %v314_v48 = vshll.u32 %v1014_v41, 30  ;;  %v203_v30 = vand.u32 3, %v202_v18  ;;  %vm548_vm14 = vcmp.lt.s32.totalorder %v547_v21, 2  ;;  %vm549_vm15 = vcmp.eq.s32.totalorder %v547_v21, 0 }
  0xd4   :  { %v171_v39 = vor.u32 %v170_v36, %v169_v35  ;;  %v174_v40 = vshll.u32 %v173_v38, 23  ;;  %vm552_vm1 = vcmp.eq.s32.totalorder %v547_v21, 2 }
  0xd5   :  { %v315_v52 = vsub.s32 %v311_v34, %v314_v48  ;;  %vm204_vm2 = vcmp.lt.s32.totalorder %v203_v30, 2  ;;  %vm205_vm3 = vcmp.eq.s32.totalorder %v203_v30, 0  ;;  %vm208_vm4 = vcmp.eq.s32.totalorder %v203_v30, 2 }
  0xd6   :  { %v175_v43 = vor.u32 4788187, %v174_v40  ;;  %v178_v50 = vcvt.s32.f32 %v171_v39  ;;  %v337_v34 = vsub.s32 4, %v1014_v41 }
  0xd7   :  { %vm316_vm9 = vcmp.lt.s32.totalorder %v315_v52, 0  ;;  %v317_v12 = vsub.s32 0, %v315_v52 }
  0xd8   :  { %v176_v45 = vand.u32 2147483647, %v175_v43 }
  0xd9   :  { %v318_v49 = vsel %vm316_vm9, %v317_v12, %v315_v52 }
  0xda   :  { %v179_v54 = vmul.f32 %v178_v50, %v176_v45  ;;  %v319_v55 = vclz %v318_v49 }
  0xdc   :  { %v180_v62 = vxor.u32 2147483648, %v179_v54  ;;  %v780_v56 = vadd.s32 4294967294, %v319_v55 }
  0xde   :  { %v181_v58 = vsel %vm60_vm10, %v180_v62, %v179_v54  ;;  %vm781_vm12 = vcmp.lt.s32.totalorder %v780_v56, 0 }
  0xdf   :  { %v184_v63 = vsel %vm1020_vm11, %v882_v22, %v181_v58  ;;  %v322_v5 = vsel %vm781_vm12, 0, %v780_v56  ;;  %vm356_vm12 = vweird.f32 %v884_v23 }
  0xe0   :  { %v186_v0 = vmul.f32 %v184_v63, %v184_v63  ;;  %v323_v25 = vsub.s32 32, %v322_v5  ;;  %v327_v7 = vsub.s32 4294967266, %v322_v5  ;;  %v324_v11 = vshll.u32 %v315_v52, %v322_v5 }
  0xe1   :  { %v338_v52 = vsel %vm215_vm13, %v337_v34, %v1014_v41 }
  0xe2   :  { %v187_v2 = vmul.f32 -0.001358992, %v186_v0  ;;  %v194_v3 = vmul.f32 -0.00019511016, %v186_v0  ;;  %v325_v13 = vshrl.u32 %v307_v6, %v323_v25  ;;  %v328_v14 = vadd.s32 127, %v327_v7 }
  0xe3   :  { %v340_v62 = vsel %vm1034_vm0, 0, %v338_v52 }
  0xe4   :  { %v188_v8 = vadd.f32 0.041655596, %v187_v2  ;;  %v195_v9 = vadd.f32 0.008332121, %v194_v3  ;;  %v326_v42 = vor.u32 %v325_v13, %v324_v11  ;;  %v329_v59 = vshll.u32 %v328_v14, 23 }
  0xe5   :  { %v357_v58 = vadd.s32 3, %v340_v62  ;;  %v701_v44 = vand.u32 3, %v340_v62 }
  0xe6   :  { %v189_v15 = vmul.f32 %v188_v8, %v186_v0  ;;  %v196_v17 = vmul.f32 %v195_v9, %v186_v0  ;;  %v330_v51 = vor.u32 4788187, %v329_v59  ;;  %v333_v53 = vcvt.s32.f32 %v326_v42 }
  0xe7   :  { %v358_v2 = vand.u32 3, %v357_v58  ;;  %vm702_vm6 = vcmp.lt.s32.totalorder %v701_v44, 2  ;;  %vm703_vm7 = vcmp.eq.s32.totalorder %v701_v44, 0  ;;  %vm706_vm8 = vcmp.eq.s32.totalorder %v701_v44, 2 }
  0xe8   :  { %v190_v1 = vadd.f32 -0.4999988, %v189_v15  ;;  %v197_v37 = vadd.f32 -0.16666654, %v196_v17  ;;  %v331_v47 = vand.u32 2147483647, %v330_v51 }
  0xe9   :  { %vm359_vm9 = vcmp.lt.s32.totalorder %v358_v2, 2  ;;  %vm360_vm10 = vcmp.eq.s32.totalorder %v358_v2, 0  ;;  %vm363_vm11 = vcmp.eq.s32.totalorder %v358_v2, 2 }
  0xea   :  { %v191_v19 = vmul.f32 %v190_v1, %v186_v0  ;;  %v198_v20 = vmul.f32 %v197_v37, %v186_v0  ;;  %v334_v31 = vmul.f32 %v333_v53, %v331_v47 }
  0xec   :  { %v192_v24 = vadd.f32 1.0, %v191_v19  ;;  %v199_v26 = vadd.f32 1.0, %v198_v20  ;;  %v335_v60 = vxor.u32 2147483648, %v334_v31 }
  0xee   :  { %v200_v32 = vmul.f32 %v199_v26, %v184_v63  ;;  %v209_v29 = vxor.u32 2147483648, %v192_v24  ;;  %v336_v28 = vsel %vm215_vm13, %v335_v60, %v334_v31  ;;  %vm400_vm13 = vcmask 130048  }
  0xef   :  { %v339_v27 = vsel %vm1034_vm0, %v884_v23, %v336_v28 }
  0xf0   :  { %v206_v46 = vxor.u32 2147483648, %v200_v32  ;;  %v554_v16 = vsel %vm552_vm1, %v209_v29, %v200_v32  ;;  %v210_v38 = vsel %vm208_vm4, %v209_v29, %v200_v32  ;;  %v341_v40 = vmul.f32 %v339_v27, %v339_v27 }
  0xf2   :  { %v551_v35 = vsel %vm549_vm15, %v192_v24, %v206_v46  ;;  %v207_v36 = vsel %vm205_vm3, %v192_v24, %v206_v46  ;;  %v342_v45 = vmul.f32 -0.001358992, %v341_v40  ;;  %v349_v50 = vmul.f32 -0.00019511016, %v341_v40 }
  0xf3   :  { %v555_v4 = vsel %vm548_vm14, %v551_v35, %v554_v16  ;;  %v211_v39 = vsel %vm204_vm2, %v207_v36, %v210_v38  ;;  %vm751_vm14 = vcmask 261248  }
  0xf4   :  { %v556_v43 = vsel %vm201_vm5, nan, %v555_v4  ;;  %v212_v48 = vsel %vm201_vm5, nan, %v211_v39  ;;  %v343_v54 = vadd.f32 0.041655596, %v342_v45  ;;  %v350_v12 = vadd.f32 0.008332121, %v349_v50 }
  0xf5   :  { %711 = vxpose.xlu0.b32.start [1/2] (short) (narrow) %v556_v43, 16  ;;  %368 = vxpose.xlu1.b32.start [1/2] (short) (narrow) %v212_v48, 16 }
  0xf6   :  { %v344_v22 = vmul.f32 %v343_v54, %v341_v40  ;;  %v351_v49 = vmul.f32 %v350_v12, %v341_v40 }
  0xf8   :  { %v345_v55 = vadd.f32 -0.4999988, %v344_v22  ;;  %v352_v57 = vadd.f32 -0.16666654, %v351_v49 }
  0xfa   :  { %v346_v61 = vmul.f32 %v345_v55, %v341_v40  ;;  %v353_v63 = vmul.f32 %v352_v57, %v341_v40 }
  0xfc   :  { %v347_v56 = vadd.f32 1.0, %v346_v61  ;;  %v354_v0 = vadd.f32 1.0, %v353_v63 }
  0xfe   :  { %v355_v3 = vmul.f32 %v354_v0, %v339_v27  ;;  %v364_v5 = vxor.u32 2147483648, %v347_v56 }
 0x100   :  { %v361_v6 = vxor.u32 2147483648, %v355_v3  ;;  %v708_v25 = vsel %vm706_vm8, %v364_v5, %v355_v3  ;;  %v365_v8 = vsel %vm363_vm11, %v364_v5, %v355_v3 }
 0x102   :  { %v705_v41 = vsel %vm703_vm7, %v347_v56, %v361_v6  ;;  %v362_v7 = vsel %vm360_vm10, %v347_v56, %v361_v6 }
 0x103   :  { %v709_v9 = vsel %vm702_vm6, %v705_v41, %v708_v25  ;;  %v366_v10 = vsel %vm359_vm9, %v362_v7, %v365_v8 }
 0x104   :  { %v710_v11 = vsel %vm356_vm12, nan, %v709_v9  ;;  %v367_v13 = vsel %vm356_vm12, nan, %v366_v10 }
 0x105   :  { %712 = vxpose.xlu0.b32.end [2/2] (short) (narrow) %v710_v11, 16  ;;  %369 = vxpose.xlu1.b32.end [2/2] (short) (narrow) %v367_v13, 16 }
 0x1a1   :  { %v727_v14 = vpop.trf.xlu0  ;;  %v384_v15 = vpop.trf.xlu1 }
 0x1a2   :  { %745 = vrot.lane.b32.xlu2 %v727_v14, %s851_s0  ;;  %401 = vst.msk [vmem:[#allocation2] sm:$0xff] %vm400_vm13, %v384_v15 }
 0x1a9   :  { %v728_v17 = vpop.trf.xlu0  ;;  %v385_v42 = vpop.trf.xlu1 }
 0x1aa   :  { %747 = vrot.lane.b32.xlu2 %v728_v17, %s851_s0  ;;  %402 = vst.msk [vmem:[#allocation2 + $0x8] sm:$0xff] %vm400_vm13, %v385_v42 }
 0x1fc   :  { %v746_v59 = vpop.permute.xlu2 %745 }
 0x1fd   :  { %752 = vst.msk [vmem:[#allocation2] sm:$0xff] %vm751_vm14, %v746_v59 }
 0x204   :  { %v748_v23 = vpop.permute.xlu2 %747 }
 0x205   :  { %753 = vst.msk [vmem:[#allocation2 + $0x8] sm:$0xff] %vm751_vm14, %v748_v23 }
 0x206   :  { %766 = dma.vmem_to_hbm [thread:$0]  %s759_s17, 256, %s761_s20, [#allocation3], %s853_s21, %s853_s21, %s854_s22  }
 0x207   :  { %842 = dma.done.wait [#allocation3], 256  }
 0x208   :  { %843 = vsyncadd [#allocation3], 4294967040 }
 0x209   :  { %771 = vsyncpa [#allocation3], 1 }

</bundles_post_ra>
